<compile_context>
chip_gen: v7x
topology: tpu7x:2x2x1
jax: 0.10.0
libtpu: 0.0.40
codegen_flags: <defaults>
</compile_context>

<pallas_src>
import jax
import jax.numpy as jnp
from jax.experimental import pallas as pl
from jax.experimental.pallas import tpu as pltpu


def _pos_enc_kernel(x_ref, enc_ref, out_ref):
    # x_ref/out_ref: (gb, f, bm) block; enc_ref: (f, bm) f32 block.
    x = x_ref[...].astype(jnp.float32)
    out_ref[...] = (x + enc_ref[...][None, :, :]).astype(out_ref.dtype)


def make_positional_encoding(embedding_size, max_len, dtype=jnp.float32):
    """Sinusoidal positional-encoding buffer (same construction as the PyTorch module)."""
    assert embedding_size % 2 == 0, "embedding_size must be even (same limitation as the PyTorch snippet)"
    position = jnp.arange(max_len, dtype=jnp.float32)[:, None]                 # (L, 1)
    period = jnp.power(
        10000.0,
        jnp.arange(0, embedding_size, 2, dtype=jnp.float32) / embedding_size,
    )                                                                          # (E//2,)
    angles = position / period                                                 # (L, E//2)
    enc = jnp.zeros((max_len, embedding_size), dtype=jnp.float32)
    enc = enc.at[:, 0::2].set(jnp.sin(angles))
    enc = enc.at[:, 1::2].set(jnp.cos(angles))
    return enc[None].astype(dtype)                                             # (1, L, E)


def _vmem_budget_bytes():
    """Per-generation VMEM budget for this kernel's double-buffered blocks."""
    try:
        cap = int(pltpu.get_tpu_info().vmem_capacity_bytes)
    except Exception:
        cap = 64 << 20  # conservative default (v7x has 64 MiB per TensorCore)
    return max(8 << 20, min(cap // 2, 64 << 20))


def positional_encoding_forward(X, encoding, *, force_pallas=False, donate_x=False):
    """Pallas equivalent of PositionalEncoding.forward (dropout=None / eval path)."""
    # TODO(synk): nn.Dropout (train-mode stochastic masking) is not implemented;
    # this matches the module's default dropout=None behaviour.
    B, S, E = X.shape
    assert encoding.ndim == 3 and encoding.shape[0] == 1 and encoding.shape[2] == E
    L = encoding.shape[1]
    assert L >= S, "sequence longer than encoding buffer max_len"

    isz = jnp.dtype(X.dtype).itemsize
    N = S * E

    enc_slice = encoding if S == L else jax.lax.slice(encoding, (0, 0, 0), (1, S, E))

    # Sublane row count: fill a 32-bit-deep sublane for the input dtype
    # (8 rows f32, 16 rows bf16, 32 rows int8). Requires N % f == 0.
    f = 32 // isz
    if N % f != 0:
        f = 8
    tiny = B * N * isz < (256 << 10)
    if (N % f != 0) or (tiny and not force_pallas):
        # Rare odd shapes, or tiny problems where pallas_call fixed overhead
        # dominates: let XLA fuse the elementwise add.
        return (X.astype(jnp.float32) + enc_slice.astype(jnp.float32)).astype(X.dtype)

    M = N // f
    budget = _vmem_budget_bytes()

    # ---- lane tile (bm): full extent, or a 128-multiple divisor of M --------
    # Cap so even a single-batch block (gb=1) double-buffers within budget:
    #   2 * (f*bm*isz [x] + f*bm*isz [out] + f*bm*4 [enc f32]) <= budget
    max_lanes = budget // (2 * f * (2 * isz + 4))
    max_lanes = max(128, min(64 * 1024, (max_lanes // 128) * 128))
    if M <= max_lanes:
        bm = M
    else:
        bm = None
        cand = max_lanes
        while cand >= 128:
            if M % cand == 0:
                bm = cand
                break
            cand -= 128
        if bm is None:
            bm = max_lanes  # partial tail block (masked stores) only as last resort

    # ---- batches per step (gb), from the remaining budget --------------------
    # Per-step VMEM (double buffered): 2 * f * bm * (2*gb*isz + 4)
    gb = int((budget / (2.0 * f * bm) - 4.0) // (2.0 * isz))
    gb = max(1, min(B, gb))

    # ---- ensure large problems use >= 2 grid steps (v7x has 2 TensorCores) ---
    if pl.cdiv(B, gb) * pl.cdiv(M, bm) == 1 and B * N * isz >= (2 << 20):
        if B >= 2:
            gb = (B + 1) // 2
        elif M >= 256:
            bm = max(128, (((M + 1) // 2 + 127) // 128) * 128)

    nb = pl.cdiv(B, gb)
    nm = pl.cdiv(M, bm)

    ws = 2 * f * bm * (2 * gb * isz + 4)  # double-buffered working set (bytes)
    vmem_limit = int(min(max(ws + (2 << 20), 4 << 20), budget + (4 << 20)))

    x3 = X.reshape(B, f, M)                               # layout-only reshape (free)
    enc2 = enc_slice.reshape(f, M).astype(jnp.float32)    # small copy: S*E f32 elements

    out3 = pl.pallas_call(
        _pos_enc_kernel,
        out_shape=jax.ShapeDtypeStruct((B, f, M), X.dtype),
        grid=(nb, nm),
        in_specs=[
            pl.BlockSpec((gb, f, bm), lambda b, j: (b, 0, j)),
            pl.BlockSpec((f, bm), lambda b, j: (0, j)),
        ],
        out_specs=pl.BlockSpec((gb, f, bm), lambda b, j: (b, 0, j)),
        compiler_params=pltpu.CompilerParams(
            dimension_semantics=("parallel", "parallel"),
            vmem_limit_bytes=vmem_limit,
        ),
        input_output_aliases=({0: 0} if donate_x else {}),
    )(x3, enc2)

    return out3.reshape(B, S, E)


if __name__ == "__main__":
    key = jax.random.PRNGKey(0)
    k1, k2 = jax.random.split(key)

    # Case 1: module-implied small shapes (batch=2, seq=8, embedding=32).
    B, S, E, L = 2, 8, 32, 16
    enc = make_positional_encoding(E, L)
    X = jax.random.normal(k1, (B, S, E), dtype=jnp.float32)
    out = positional_encoding_forward(X, enc, force_pallas=True)
    jax.block_until_ready(out)
    ref = X + enc[:, :S, :]
    assert out.shape == (B, S, E)
    assert jnp.allclose(out, ref, atol=1e-6, rtol=1e-6)

    # Case 2: slightly larger, exercises the packed-layout tiling path.
    B2, S2, E2, L2 = 4, 64, 128, 128
    enc2 = make_positional_encoding(E2, L2)
    X2 = jax.random.normal(k2, (B2, S2, E2), dtype=jnp.float32)
    out2 = positional_encoding_forward(X2, enc2, force_pallas=True)
    jax.block_until_ready(out2)
    ref2 = X2 + enc2[:, :S2, :]
    assert out2.shape == (B2, S2, E2)
    assert jnp.allclose(out2, ref2, atol=1e-6, rtol=1e-6)

    print("KERNEL_OK")
</pallas_src>

<mosaic_0001>
module attributes {stable_mosaic.version = 11 : i64} {
  func.func @_pos_enc_kernel(%arg0: i32, %arg1: i32, %arg2: memref<2x8x32xf32, #tpu.memory_space<vmem>>, %arg3: memref<8x32xf32, #tpu.memory_space<vmem>>, %arg4: memref<2x8x32xf32, #tpu.memory_space<vmem>>) attributes {dimension_semantics = [#tpu.dimension_semantics<parallel>, #tpu.dimension_semantics<parallel>], iteration_bounds = array<i64: 1, 1>, scalar_prefetch = 0 : i64, scratch_operands = 0 : i64, tpu.core_type = #tpu.core_type<tc>, window_params = [{transform_indices = @transform_0, window_bounds = array<i64: 2, 8, 32>}, {transform_indices = @transform_1, window_bounds = array<i64: 8, 32>}, {transform_indices = @transform_2, window_bounds = array<i64: 2, 8, 32>}]} {
    %c0 = arith.constant 0 : index
    %c0_0 = arith.constant 0 : index
    %c0_1 = arith.constant 0 : index
    %0 = vector.load %arg2[%c0, %c0_0, %c0_1] : memref<2x8x32xf32, #tpu.memory_space<vmem>>, vector<2x8x32xf32>
    %c0_2 = arith.constant 0 : index
    %c0_3 = arith.constant 0 : index
    %1 = vector.load %arg3[%c0_2, %c0_3] : memref<8x32xf32, #tpu.memory_space<vmem>>, vector<8x32xf32>
    %2 = vector.shape_cast %1 : vector<8x32xf32> to vector<1x8x32xf32>
    %3 = vector.broadcast %2 : vector<1x8x32xf32> to vector<2x8x32xf32>
    %4 = arith.addf %0, %3 : vector<2x8x32xf32>
    %c0_4 = arith.constant 0 : index
    %c0_5 = arith.constant 0 : index
    %c0_6 = arith.constant 0 : index
    %5 = vector.load %arg4[%c0_4, %c0_5, %c0_6] : memref<2x8x32xf32, #tpu.memory_space<vmem>>, vector<2x8x32xf32>
    tpu.vector_store %arg4[%c0_4, %c0_5, %c0_6], %4 {strides = array<i32>} : memref<2x8x32xf32, #tpu.memory_space<vmem>>, vector<2x8x32xf32>,
    return
  }
  func.func @transform_0(%arg0: i32, %arg1: i32) -> (i32, i32, i32) {
    %c0_i32 = arith.constant 0 : i32
    %c0_i32_0 = arith.constant 0 : i32
    return %arg0, %c0_i32, %arg1 : i32, i32, i32
  }
  func.func @transform_1(%arg0: i32, %arg1: i32) -> (i32, i32) {
    %c0_i32 = arith.constant 0 : i32
    %c0_i32_0 = arith.constant 0 : i32
    return %c0_i32, %arg1 : i32, i32
  }
  func.func @transform_2(%arg0: i32, %arg1: i32) -> (i32, i32, i32) {
    %c0_i32 = arith.constant 0 : i32
    %c0_i32_0 = arith.constant 0 : i32
    return %arg0, %c0_i32, %arg1 : i32, i32, i32
  }
}

</mosaic_0001>

<bundles_post_ra>
// kernel: tpu_custom_call.1
= control target key start
LH: loop header
LB: loop body
LE: loop exit
PB: predicated region body
PF: predicated region fallthrough
CT: control target
= control target key end

     0   :  { %7 = vsyncpa [#allocation3], 0  ;;  %s203_s0 = inlined_call_operand.hbm [shape: f32[2,8,32], index: 0, kind: input, shape index: {}]   ;;  %s204_s1 = inlined_call_operand.hbm [shape: f32[8,32], index: 1, kind: input, shape index: {}]   ;;  %s205_s2 = inlined_call_operand.hbm [shape: f32[2,8,32], index: 2, kind: output, shape index: {}]  }
   0x1   :  { %8 = vsyncpa [#allocation6], 0 }
   0x2   :  { %9 = vsyncpa [#allocation4], 0  ;;  %s141_s9 = smov [#allocation2]   ;;  %s69_s13 = scalar_lea.hbm %s203_s0, 256 }
   0x3   :  { %s15_s10 = sshll.u32 %s141_s9, 4  ;;  %p70_p0 = scmp.ne.s32.totalorder %s203_s0, %s69_s13  ;;  %s16_s10 = int_to_ptr.vmem [resolvable:$true] %s15_s10 }
   0x4   :  { %p73_p1 = scmp.lt.u32.totalorder %s69_s13, %s203_s0 }
   0x6   :  { %p75_p2 = pnand %p73_p1, %p70_p0 }
   0x8   :  { %78 = shalt.err (!%p75_p2)
}
   0x9   :  { %s79_s18 = scalar_lea.vmem %s16_s10, 256  ;;  %p84_p4 = scmp.lt.s32.totalorder %s16_s10, %s16_s10 }
   0xa   :  { %p80_p3 = scmp.ne.s32.totalorder %s16_s10, %s79_s18  ;;  %p85_p5 = scmp.lt.s32.totalorder %s79_s18, %s79_s18 }
   0xc   :  { %p86_p6 = por %p85_p5, %p84_p4 }
   0xe   :  { %p87_p7 = pnand %p86_p6, %p80_p3 }
  0x10   :  { %90 = shalt.err (!%p87_p7)
}
  0x11   :  { %s142_s19 = smov 128   ;;  %s143_s20 = smov 8  }
  0x12   :  { %21 = dma.hbm_to_vmem [thread:$0]  %s203_s0, 256, %s16_s10, [#allocation3], %s142_s19, %s142_s19, %s143_s20  }
  0x13   :  { %s144_s23 = smov [#allocation5]   ;;  %s91_s27 = scalar_lea.hbm %s204_s1, 128 }
  0x14   :  { %s28_s24 = sshll.u32 %s144_s23, 4  ;;  %p92_p8 = scmp.ne.s32.totalorder %s204_s1, %s91_s27  ;;  %s29_s24 = int_to_ptr.vmem [resolvable:$true] %s28_s24 }
  0x15   :  { %p95_p9 = scmp.lt.u32.totalorder %s91_s27, %s204_s1 }
  0x17   :  { %p97_p10 = pnand %p95_p9, %p92_p8 }
  0x19   :  { %100 = shalt.err (!%p97_p10)
}
  0x1a   :  { %s101_s4 = scalar_lea.vmem %s29_s24, 128  ;;  %p106_p12 = scmp.lt.s32.totalorder %s29_s24, %s29_s24 }
  0x1b   :  { %p102_p11 = scmp.ne.s32.totalorder %s29_s24, %s101_s4  ;;  %p107_p13 = scmp.lt.s32.totalorder %s101_s4, %s101_s4 }
  0x1d   :  { %p108_p0 = por %p107_p13, %p106_p12 }
  0x1f   :  { %p109_p1 = pnand %p108_p0, %p102_p11 }
  0x21   :  { %112 = shalt.err (!%p109_p1)
}
  0x22   :  { %31 = dma.hbm_to_vmem [thread:$0]  %s204_s1, 128, %s29_s24, [#allocation6]  }
  0x23   :  { %135 = dma.done.wait [#allocation3], 256  }
  0x24   :  { %136 = vsyncadd [#allocation3], 4294967040 }
  0x25   :  { %137 = dma.done.wait [#allocation6], 128  }
  0x26   :  { %138 = vsyncadd [#allocation6], 4294967168  ;;  %s145_s6 = smov [#allocation7]   ;;  %v38_v0 = vld [vmem:[#allocation2] sm:$0xff]  ;;  %v40_v1 = vld [vmem:[#allocation5] sm:$0xff]  ;;  %vm43_vm0 = vcmask 261120  }
  0x27   :  { %s51_s7 = sshll.u32 %s145_s6, 4  ;;  %v39_v2 = vld [vmem:[#allocation2 + $0x8] sm:$0xff]  ;;  %v41_v3 = vadd.f32 %v40_v1, %v38_v0  ;;  %s52_s7 = int_to_ptr.vmem [resolvable:$true] %s51_s7 }
  0x28   :  { %v42_v4 = vadd.f32 %v40_v1, %v39_v2  ;;  %s113_s8 = scalar_lea.vmem %s52_s7, 256  ;;  %p118_p3 = scmp.lt.s32.totalorder %s52_s7, %s52_s7 }
  0x29   :  { %44 = vst.msk [vmem:[#allocation7] sm:$0xff] %vm43_vm0, %v41_v3  ;;  %p114_p2 = scmp.ne.s32.totalorder %s52_s7, %s113_s8  ;;  %p119_p4 = scmp.lt.s32.totalorder %s113_s8, %s113_s8 }
  0x2a   :  { %45 = vst.msk [vmem:[#allocation7 + $0x8] sm:$0xff] %vm43_vm0, %v42_v4 }
  0x2b   :  { %p120_p5 = por %p119_p4, %p118_p3 }
  0x2d   :  { %p121_p6 = pnand %p120_p5, %p114_p2 }
  0x2f   :  { %124 = shalt.err (!%p121_p6)
}
  0x30   :  { %s125_s10 = scalar_lea.hbm %s205_s2, 256 }
  0x31   :  { %p126_p7 = scmp.ne.s32.totalorder %s205_s2, %s125_s10  ;;  %p129_p8 = scmp.lt.u32.totalorder %s125_s10, %s205_s2 }
  0x33   :  { %p131_p9 = pnand %p129_p8, %p126_p7 }
  0x35   :  { %134 = shalt.err (!%p131_p9)
}
  0x36   :  { %57 = dma.vmem_to_hbm [thread:$0]  %s52_s7, 256, %s205_s2, [#allocation4], %s142_s19, %s142_s19, %s143_s20  }
  0x37   :  { %139 = dma.done.wait [#allocation4], 256  }
  0x38   :  { %140 = vsyncadd [#allocation4], 4294967040 }
  0x39   :  { %61 = vsyncpa [#allocation3], 1 }
  0x3a   :  { %62 = vsyncpa [#allocation6], 1 }
  0x3b   :  { %63 = vsyncpa [#allocation4], 1 }

</bundles_post_ra>
